<compile_context>
chip_gen: v6e
topology: v6e:2x2x1
jax: 0.10.0
libtpu: 0.0.40
codegen_flags: <defaults>
</compile_context>

<pallas_src>
import functools

import jax
import jax.numpy as jnp
from jax.experimental import pallas as pl
from jax.experimental.pallas import tpu as pltpu

_MIB = 1024 * 1024


def _proj_kernel(x_ref, w_ref, b_ref, o_ref):
    # x_ref: (tm, K), w_ref: (K, E), b_ref: (1, E) f32, o_ref: (tm, E)
    acc = jnp.dot(x_ref[...], w_ref[...], preferred_element_type=jnp.float32)
    o_ref[...] = (acc + b_ref[...]).astype(o_ref.dtype)


def _round_up(x, m):
    return ((x + m - 1) // m) * m


def _vmem_limit_bytes():
    """Per-generation scoped-VMEM limit handed to Mosaic.

    v5e/v6e: 128 MiB physical -> 64 MiB limit; v7x: 64 MiB -> 32 MiB.
    Conservative 32 MiB fallback if the query is unavailable.
    """
    try:
        cap = int(pltpu.get_tpu_info().vmem_capacity_bytes)
    except Exception:  # pragma: no cover — non-TPU backends / older jax
        cap = 64 * _MIB
    return int(min(cap // 2, 64 * _MIB))


def _pick_tm(M, K, E, in_itemsize, out_itemsize, tile_budget, tm_max=8192):
    """Pick the M-tile.

    Rules (per perf review):
      * never a single-block grid when M >= 512: the "parallel" grid axis is
        sharded across v7x's 2 TensorCores, so emit >= 2 (roughly even) steps;
      * as large as fits the per-generation VMEM budget (double-buffered
        input+output tiles + resident weight/bias), capped at tm_max so the
        per-step pipeline overhead stays negligible without exploding VMEM.
    """
    if M <= 512:
        return M  # tiny problem: one full-extent block is legal and cheapest.

    def need(t):
        return (2 * t * K * in_itemsize      # double-buffered input tile
                + 2 * t * E * out_itemsize   # double-buffered output tile
                + K * E * in_itemsize        # resident weight
                + 4 * E * 4)                 # resident bias (generous)

    g = 2
    while True:
        tm = _round_up(pl.cdiv(M, g), 8)     # sublane-aligned
        if tm <= tm_max and need(tm) <= tile_budget:
            return tm
        g += 2                               # keep the grid length ~even


def _projection(patches, w2, b2, out_dtype, tm, vmem_limit):
    M, K = patches.shape
    E = w2.shape[1]
    in_item = patches.dtype.itemsize
    out_item = jnp.dtype(out_dtype).itemsize
    cost = pl.CostEstimate(
        flops=2 * M * K * E,
        transcendentals=0,
        bytes_accessed=(M * K * in_item + K * E * in_item + E * 4
                        + M * E * out_item),
    )
    return pl.pallas_call(
        _proj_kernel,
        out_shape=jax.ShapeDtypeStruct((M, E), out_dtype),
        grid_spec=pltpu.PrefetchScalarGridSpec(
            num_scalar_prefetch=0,
            grid=(pl.cdiv(M, tm),),          # ragged tail rows are masked out
            in_specs=[
                pl.BlockSpec((tm, K), lambda i: (i, 0)),
                pl.BlockSpec((K, E), lambda i: (0, 0)),   # weight: resident
                pl.BlockSpec((1, E), lambda i: (0, 0)),   # bias:   resident
            ],
            out_specs=pl.BlockSpec((tm, E), lambda i: (i, 0)),
        ),
        compiler_params=pltpu.CompilerParams(
            dimension_semantics=("parallel",),            # megacore sharding
            vmem_limit_bytes=vmem_limit,
            # Let XLA fuse the im2col reshape/transpose producer into the
            # `patches` operand instead of round-tripping (M, K) through HBM.
            allow_input_fusion=[True, False, False],
        ),
        cost_estimate=cost,
    )(patches, w2, b2)


@functools.partial(
    jax.jit, static_argnames=("patch_size", "compute_dtype", "out_dtype"))
def patch_embed_3d(x, weight, bias, patch_size=(4, 4, 4),
                   compute_dtype=None, out_dtype=None):
    """x: (B, C, T, H, W); weight: (E, C, pt, ph, pw); bias: (E,).

    Returns (B, T//pt, H//ph, W//pw, E) — matches PyTorch PatchEmbed3d.forward.
    compute_dtype: dtype for the GEMM inputs (e.g. jnp.bfloat16); default x.dtype.
    out_dtype:     output dtype; default x.dtype.
    """
    B, C, T, H, W = x.shape
    pt, ph, pw = patch_size
    E = weight.shape[0]
    Tp, Hp, Wp = T // pt, H // ph, W // pw
    if Tp == 0 or Hp == 0 or Wp == 0:
        raise ValueError(
            f"input spatial dims {(T, H, W)} smaller than patch {patch_size}")
    K = C * pt * ph * pw
    M = B * Tp * Hp * Wp

    compute_dtype = x.dtype if compute_dtype is None else jnp.dtype(compute_dtype)
    out_dtype = x.dtype if out_dtype is None else jnp.dtype(out_dtype)

    # Cast BEFORE the im2col so any materialized intermediate (and the
    # transpose's HBM reads/writes) is already in the narrow compute dtype.
    if x.dtype != compute_dtype:
        x = x.astype(compute_dtype)

    # Conv3d with stride == kernel drops any remainder along T/H/W.
    if (T, H, W) != (Tp * pt, Hp * ph, Wp * pw):
        x = x[:, :, :Tp * pt, :Hp * ph, :Wp * pw]

    # im2col: non-overlapping patches, flattened in (C, pt, ph, pw) order so a
    # single dense (K, E) projection reproduces Conv3d(kernel=stride=patch).
    patches = x.reshape(B, C, Tp, pt, Hp, ph, Wp, pw)
    patches = patches.transpose(0, 2, 4, 6, 1, 3, 5, 7)  # B,Tp,Hp,Wp,C,pt,ph,pw
    patches = patches.reshape(M, K)

    w2 = weight.reshape(E, K).T.astype(compute_dtype)    # (K, E)
    b2 = bias.reshape(1, E).astype(jnp.float32)

    vmem_limit = _vmem_limit_bytes()
    tm = _pick_tm(M, K, E,
                  in_itemsize=jnp.dtype(compute_dtype).itemsize,
                  out_itemsize=jnp.dtype(out_dtype).itemsize,
                  tile_budget=int(vmem_limit * 0.75))

    out = _projection(patches, w2, b2, out_dtype, tm, vmem_limit)
    return out.reshape(B, Tp, Hp, Wp, E)


def _reference(x, weight, bias, patch_size):
    # Pure-JAX reference of Conv3d(kernel=stride=patch) + permute, computed
    # with HIGHEST matmul precision so it is a trustworthy f32 baseline.
    B, C, T, H, W = x.shape
    pt, ph, pw = patch_size
    E = weight.shape[0]
    Tp, Hp, Wp = T // pt, H // ph, W // pw
    x = x[:, :, :Tp * pt, :Hp * ph, :Wp * pw]
    patches = x.reshape(B, C, Tp, pt, Hp, ph, Wp, pw)
    patches = patches.transpose(0, 2, 4, 6, 1, 3, 5, 7).reshape(
        B, Tp, Hp, Wp, C * pt * ph * pw)
    w2 = weight.reshape(E, -1)
    return jnp.einsum("bthwk,ek->bthwe", patches, w2,
                      precision="highest") + bias


if __name__ == "__main__":
    key = jax.random.PRNGKey(0)
    k_x, k_w, k_b, k_x2 = jax.random.split(key, 4)

    # Shapes consistent with the module: patch_size=(4,4,4), in_chans=1.
    patch_size = (4, 4, 4)
    in_chans, embed_dim = 1, 128

    fan_in = in_chans * patch_size[0] * patch_size[1] * patch_size[2]
    weight = jax.random.normal(
        k_w, (embed_dim, in_chans) + patch_size, dtype=jnp.float32
    ) * (1.0 / (fan_in ** 0.5))
    bias = jax.random.normal(k_b, (embed_dim,), dtype=jnp.float32) * 0.01

    # 1) Small shape, f32 hot path, single-block grid.
    #    Tolerance accommodates MXU pass-decomposition of f32 matmuls; a
    #    semantic bug (wrong patch ordering) would produce O(1) errors.
    B, T, H, W = 2, 8, 16, 16
    x = jax.random.normal(k_x, (B, in_chans, T, H, W), dtype=jnp.float32)
    ref = _reference(x, weight, bias, patch_size)
    out = jax.block_until_ready(
        patch_embed_3d(x, weight, bias, patch_size=patch_size))
    assert out.shape == (B, T // 4, H // 4, W // 4, embed_dim), out.shape
    assert out.dtype == jnp.float32
    assert jnp.max(jnp.abs(out - ref)) < 2e-2

    # 2) Larger shape with a spatial remainder (cropped like Conv3d does),
    #    a multi-step "parallel" grid (>=2 steps for v7x megacore), and bf16
    #    GEMM inputs with f32 MXU accumulation: loose check.
    B2, T2, H2, W2 = 2, 16, 34, 40          # H2 % 4 != 0 -> remainder cropped
    x2 = jax.random.normal(k_x2, (B2, in_chans, T2, H2, W2), dtype=jnp.float32)
    ref2 = _reference(x2, weight, bias, patch_size)
    out2 = jax.block_until_ready(
        patch_embed_3d(x2, weight, bias, patch_size=patch_size,
                       compute_dtype=jnp.bfloat16))
    assert out2.shape == ref2.shape, (out2.shape, ref2.shape)
    assert out2.dtype == jnp.float32
    assert jnp.max(jnp.abs(out2 - ref2)) < 5e-2

    print("KERNEL_OK")
</pallas_src>

<mosaic_0001>
module attributes {stable_mosaic.version = 11 : i64} {
  func.func @_proj_kernel(%arg0: i32, %arg1: memref<64x64xf32, #tpu.memory_space<vmem>>, %arg2: memref<64x128xf32, #tpu.memory_space<vmem>>, %arg3: memref<1x128xf32, #tpu.memory_space<vmem>>, %arg4: memref<64x128xf32, #tpu.memory_space<vmem>>) attributes {dimension_semantics = [#tpu.dimension_semantics<parallel>], iteration_bounds = array<i64: 1>, scalar_prefetch = 0 : i64, scratch_operands = 0 : i64, tpu.core_type = #tpu.core_type<tc>, window_params = [{transform_indices = @transform_0, window_bounds = array<i64: 64, 64>}, {pipeline_mode = #tpu.pipeline_mode<synchronous>, transform_indices = @transform_1, window_bounds = array<i64: 64, 128>}, {pipeline_mode = #tpu.pipeline_mode<synchronous>, transform_indices = @transform_2, window_bounds = array<i64: 1, 128>}, {transform_indices = @transform_3, window_bounds = array<i64: 64, 128>}]} {
    %c0 = arith.constant 0 : index
    %c0_0 = arith.constant 0 : index
    %0 = vector.load %arg1[%c0, %c0_0] : memref<64x64xf32, #tpu.memory_space<vmem>>, vector<64x64xf32>
    %c0_1 = arith.constant 0 : index
    %c0_2 = arith.constant 0 : index
    %1 = vector.load %arg2[%c0_1, %c0_2] : memref<64x128xf32, #tpu.memory_space<vmem>>, vector<64x128xf32>
    %cst = arith.constant dense<0.000000e+00> : vector<64x128xf32>
    %2 = tpu.matmul %0, %1, %cst {dimension_numbers = #tpu.dot_dimension_numbers<[1], [0], [0], [1], [0, 0, 1, 1], [], []>} : vector<64x64xf32>, vector<64x128xf32>, vector<64x128xf32> -> vector<64x128xf32>
    %c0_3 = arith.constant 0 : index
    %c0_4 = arith.constant 0 : index
    %3 = vector.load %arg3[%c0_3, %c0_4] : memref<1x128xf32, #tpu.memory_space<vmem>>, vector<1x128xf32>
    %4 = vector.broadcast %3 : vector<1x128xf32> to vector<64x128xf32>
    %5 = arith.addf %2, %4 : vector<64x128xf32>
    %c0_5 = arith.constant 0 : index
    %c0_6 = arith.constant 0 : index
    %6 = vector.load %arg4[%c0_5, %c0_6] : memref<64x128xf32, #tpu.memory_space<vmem>>, vector<64x128xf32>
    tpu.vector_store %arg4[%c0_5, %c0_6], %5 {strides = array<i32>} : memref<64x128xf32, #tpu.memory_space<vmem>>, vector<64x128xf32>,
    return
  }
  func.func @transform_0(%arg0: i32) -> (i32, i32) {
    %c0_i32 = arith.constant 0 : i32
    %c0_i32_0 = arith.constant 0 : i32
    return %arg0, %c0_i32 : i32, i32
  }
  func.func @transform_1(%arg0: i32) -> (i32, i32) {
    %c0_i32 = arith.constant 0 : i32
    %c0_i32_0 = arith.constant 0 : i32
    %c0_i32_1 = arith.constant 0 : i32
    return %c0_i32, %c0_i32_0 : i32, i32
  }
  func.func @transform_2(%arg0: i32) -> (i32, i32) {
    %c0_i32 = arith.constant 0 : i32
    %c0_i32_0 = arith.constant 0 : i32
    %c0_i32_1 = arith.constant 0 : i32
    return %c0_i32, %c0_i32_0 : i32, i32
  }
  func.func @transform_3(%arg0: i32) -> (i32, i32) {
    %c0_i32 = arith.constant 0 : i32
    %c0_i32_0 = arith.constant 0 : i32
    return %arg0, %c0_i32 : i32, i32
  }
}

</mosaic_0001>

<bundles_post_ra>
// kernel: patch_embed_3d.1
= control target key start
LH: loop header
LB: loop body
LE: loop exit
PB: predicated region body
PF: predicated region fallthrough
CT: control target
= control target key end

     0   :  { %s371_s0 = inlined_call_operand.vmem [shape: f32[64,64], index: 0, kind: input, shape index: {}]   ;;  %s372_s1 = inlined_call_operand.vmem [shape: f32[64,128], index: 1, kind: input, shape index: {}]   ;;  %s373_s2 = inlined_call_operand.vmem [shape: f32[1,128], index: 2, kind: input, shape index: {}]   ;;  %s374_s3 = inlined_call_operand.hbm [shape: f32[64,128], index: 3, kind: output, shape index: {}]  }
   0x1   :  { %v30_v0 = vld [vmem:[%s372_s1 + $0x38] sm:$0xff]  ;;  %v29_v1 = vld [vmem:[%s372_s1 + $0x30] sm:$0xff]  ;;  %v28_v2 = vld [vmem:[%s372_s1 + $0x28] sm:$0xff] }
   0x2   :  { %217 = vmatprep.subr.mxu0 %v30_v0  ;;  %245 = vmatprep.subr.mxu1 %v30_v0  ;;  %v27_v3 = vld [vmem:[%s372_s1 + $0x20] sm:$0xff] }
   0x3   :  { %218 = vmatpush3.msra.mxu0 %v30_v0  ;;  %253 = vmatpush3.msra.mxu1 %v30_v0 }
   0x4   :  { %219 = vmatprep.subr.mxu0 %v29_v1  ;;  %246 = vmatprep.subr.mxu1 %v29_v1 }
   0x5   :  { %220 = vmatpush3.msra.mxu0 %v29_v1  ;;  %254 = vmatpush3.msra.mxu1 %v29_v1 }
   0x6   :  { %221 = vmatprep.subr.mxu0 %v28_v2  ;;  %247 = vmatprep.subr.mxu1 %v28_v2 }
   0x7   :  { %8 = vsyncpa [#allocation3], 0  ;;  %222 = vmatpush3.msra.mxu0 %v28_v2  ;;  %255 = vmatpush3.msra.mxu1 %v28_v2  ;;  %v26_v4 = vld [vmem:[%s372_s1 + $0x18] sm:$0xff]  ;;  %v25_v5 = vld [vmem:[%s372_s1 + $0x10] sm:$0xff]  ;;  %vm38_vm0 = vcmask 523264   ;;  %s286_s18 = smov [#allocation2]  }
   0x8   :  { %223 = vmatprep.subr.mxu0 %v27_v3  ;;  %248 = vmatprep.subr.mxu1 %v27_v3  ;;  %v24_v6 = vld [vmem:[%s372_s1 + $0x8] sm:$0xff]  ;;  %v23_v7 = vld [vmem:[%s372_s1] sm:$0xff]  ;;  %v17_v12 = vld [vmem:[%s371_s0 + $0x10] sm:$0xff] }
   0x9   :  { %224 = vmatpush3.msra.mxu0 %v27_v3  ;;  %256 = vmatpush3.msra.mxu1 %v27_v3  ;;  %v15_v8 = vld [vmem:[%s371_s0] sm:$0xff]  ;;  %v16_v10 = vld [vmem:[%s371_s0 + $0x8] sm:$0xff]  ;;  %v21_v13 = vld [vmem:[%s371_s0 + $0x30] sm:$0xff] }
   0xa   :  { %225 = vmatprep.subr.mxu0 %v26_v4  ;;  %249 = vmatprep.subr.mxu1 %v26_v4  ;;  %v19_v9 = vld [vmem:[%s371_s0 + $0x20] sm:$0xff]  ;;  %v20_v11 = vld [vmem:[%s371_s0 + $0x28] sm:$0xff]  ;;  %v18_v14 = vld [vmem:[%s371_s0 + $0x18] sm:$0xff] }
   0xb   :  { %226 = vmatpush3.msra.mxu0 %v26_v4  ;;  %257 = vmatpush3.msra.mxu1 %v26_v4  ;;  %v22_v15 = vld [vmem:[%s371_s0 + $0x38] sm:$0xff]  ;;  %v192_v16 = vld [vmem:[%s373_s2] ss:$0 sm:$0xff]  ;;  %s181_s0 = sshll.u32 %s286_s18, 4  ;;  %s182_s0 = int_to_ptr.vmem [resolvable:$true] %s181_s0 }
   0xc   :  { %227 = vmatprep.subr.mxu0 %v25_v5  ;;  %250 = vmatprep.subr.mxu1 %v25_v5  ;;  %s264_s2 = scalar_lea.vmem %s182_s0, 1024  ;;  %p269_p1 = scmp.lt.s32.totalorder %s182_s0, %s182_s0 }
   0xd   :  { %228 = vmatpush3.msra.mxu0 %v25_v5  ;;  %258 = vmatpush3.msra.mxu1 %v25_v5  ;;  %p265_p0 = scmp.ne.s32.totalorder %s182_s0, %s264_s2  ;;  %p270_p2 = scmp.lt.s32.totalorder %s264_s2, %s264_s2 }
   0xe   :  { %229 = vmatprep.subr.mxu0 %v24_v6  ;;  %251 = vmatprep.subr.mxu1 %v24_v6 }
   0xf   :  { %230 = vmatpush3.msra.mxu0 %v24_v6  ;;  %259 = vmatpush3.msra.mxu1 %v24_v6  ;;  %p271_p3 = por %p270_p2, %p269_p1 }
  0x10   :  { %231 = vmatprep.subr.mxu0 %v23_v7  ;;  %252 = vmatprep.subr.mxu1 %v23_v7 }
  0x11   :  { %232 = vmatpush3.msra.mxu0 %v23_v7  ;;  %260 = vmatpush3.msra.mxu1 %v23_v7  ;;  %p272_p4 = pnand %p271_p3, %p265_p0 }
  0x12   :  { %233 = vmatprep.mubr.msk.f32.mxu0 %vm38_vm0, %v15_v8  ;;  %239 = vmatprep.mubr.msk.f32.mxu1 %vm38_vm0, %v19_v9 }
  0x13   :  { %234 = vmatmul.mubr.msk.f32.vlgmr.msra.gmra.mxu0 %vm38_vm0, %v16_v10  ;;  %240 = vmatmul.mubr.msk.f32.vlgmr.msra.gmra.mxu1 %vm38_vm0, %v20_v11 }
  0x14   :  { %236 = vmatprep.mubr.msk.f32.mxu0 %vm38_vm0, %v17_v12  ;;  %242 = vmatprep.mubr.msk.f32.mxu1 %vm38_vm0, %v21_v13 }
  0x17   :  { %237 = vmatmul.mubr.msk.f32.gmra.mxu0 %vm38_vm0, %v18_v14  ;;  %243 = vmatmul.mubr.msk.f32.gmra.mxu1 %vm38_vm0, %v22_v15 }
  0xd3   :  { %v235_v17 = vpop.f32.mrf.mxu0  ;;  %v241_v18 = vpop.f32.mrf.mxu1 }
  0xd4   :  { %v135_v19 = vadd.f32 %v235_v17, %v192_v16  ;;  %v155_v20 = vadd.f32 %v241_v18, %v192_v16 }
  0xd5   :  { %v129_v21 = vpop.f32.mrf.mxu0  ;;  %v149_v22 = vpop.f32.mrf.mxu1 }
  0xd6   :  { %169 = vst [vmem:[#allocation2 + $0x8] sm:$0xff] %v135_v19  ;;  %173 = vst [vmem:[#allocation2 + $0x28] sm:$0xff] %v155_v20  ;;  %v130_v23 = vadd.f32 %v192_v16, %v129_v21  ;;  %v150_v24 = vadd.f32 %v192_v16, %v149_v22 }
  0xd7   :  { %v238_v25 = vpop.f32.mrf.mxu0  ;;  %v244_v26 = vpop.f32.mrf.mxu1 }
  0xd8   :  { %168 = vst [vmem:[#allocation2] sm:$0xff] %v130_v23  ;;  %172 = vst [vmem:[#allocation2 + $0x20] sm:$0xff] %v150_v24  ;;  %v145_v27 = vadd.f32 %v238_v25, %v192_v16  ;;  %v165_v28 = vadd.f32 %v244_v26, %v192_v16 }
  0xd9   :  { %v139_v29 = vpop.f32.mrf.mxu0  ;;  %v159_v30 = vpop.f32.mrf.mxu1 }
  0xda   :  { %171 = vst [vmem:[#allocation2 + $0x18] sm:$0xff] %v145_v27  ;;  %175 = vst [vmem:[#allocation2 + $0x38] sm:$0xff] %v165_v28  ;;  %v140_v31 = vadd.f32 %v192_v16, %v139_v29  ;;  %v160_v32 = vadd.f32 %v192_v16, %v159_v30 }
  0xdc   :  { %170 = vst [vmem:[#allocation2 + $0x10] sm:$0xff] %v140_v31  ;;  %174 = vst [vmem:[#allocation2 + $0x30] sm:$0xff] %v160_v32 }
  0xdd   :  { %275 = shalt.err (!%p272_p4)
}
  0xde   :  { %s287_s19 = smov 128   ;;  %s288_s20 = smov 8  }
  0xdf   :  { %187 = dma.vmem_to_hbm [thread:$0]  %s182_s0, 1024, %s374_s3, [#allocation3], %s287_s19, %s287_s19, %s288_s20  }
  0xe0   :  { %284 = dma.done.wait [#allocation3], 1024  }
  0xe1   :  { %285 = vsyncadd [#allocation3], 4294966272 }
  0xe2   :  { %191 = vsyncpa [#allocation3], 1 }

</bundles_post_ra>
